<compile_context>
chip_gen: v5e
topology: v5e:2x2
jax: 0.10.0
libtpu: 0.0.40
codegen_flags: <defaults>
</compile_context>

<pallas_src>
import functools

import jax
import jax.numpy as jnp
import numpy as np
from jax.experimental import pallas as pl
from jax.experimental.pallas import tpu as pltpu

EPS = 1e-8                       # nn.CosineSimilarity default eps


def _vmem_budget_bytes():
    """(working-set budget, physical VMEM) — generation aware."""
    try:
        cap = pltpu.get_tpu_info().vmem_capacity_bytes
    except Exception:
        cap = 64 * 1024 * 1024   # conservative fallback (v7x per-TC VMEM)
    budget = max(4 * 1024 * 1024, min(cap // 3, 24 * 1024 * 1024))
    return budget, cap


def _plan_tiling(R, C, itemsize, mask_itemsize, batch, max_rows_override=None):
    """Pick ROWS (pixel rows of 128 lanes per block) and the grid split."""
    budget, cap = _vmem_budget_bytes()
    # Mosaic pads the channel (sublane) dim of each (C, ROWS, 128) block.
    pack = 8 * max(1, 4 // max(1, itemsize))
    c_pad = -(-C // pack) * pack
    # Bytes resident in VMEM per row-of-128 pixels:
    #   x + t double-buffered (sublane-padded C) + mask (x2) + 3 f32 accumulators (x2).
    per_row = (4 * c_pad * itemsize + 2 * mask_itemsize + 6 * 4) * 128
    max_rows = max(8, budget // per_row)
    if max_rows_override is not None:
        max_rows = max_rows_override

    if R <= max_rows:
        rows = R
        # On a 2-TC part a batch-1 input would leave a core idle: split the
        # pixel axis in two when it is big enough to matter.
        if batch == 1 and R >= 16:
            rows = ((R + 1) // 2 + 7) // 8 * 8
    else:
        max_rows = max(8, (max_rows // 8) * 8)
        lo = max(8, (max_rows // 2 // 8) * 8)
        rows = 0
        for cand in range(max_rows, lo - 1, -8):   # prefer an exact divisor
            if R % cand == 0:
                rows = cand
                break
        if rows == 0:
            rows = max_rows                        # ragged last block (masked)

    pb = -(-R // rows)                             # logical row blocks per image
    po = 2 if pb >= 2 else 1                       # parallel pixel-group axis
    pi = -(-pb // po)                              # reduction (innermost) axis
    needs_mask = (po * pi * rows) != R             # ragged rows or phantom blocks
    return rows, pb, po, pi, needs_mask, cap


def _cosine_kernel(*refs, has_mask, rows, r_valid, pi_ext, needs_mask):
    if has_mask:
        x_ref, t_ref, m_ref, cos_ref, obj_ref, cnt_ref = refs
    else:
        x_ref, t_ref, cos_ref = refs

    pi = pl.program_id(2)

    @pl.when(pi == 0)
    def _():
        cos_ref[...] = jnp.zeros_like(cos_ref)
        if has_mask:
            obj_ref[...] = jnp.zeros_like(obj_ref)
            cnt_ref[...] = jnp.zeros_like(cnt_ref)

    x = x_ref[...].astype(jnp.float32)             # [C, rows, 128]
    t = t_ref[...].astype(jnp.float32)

    dot = jnp.sum(x * t, axis=0)                   # [rows, 128] (plain vreg adds)
    nx2 = jnp.sum(x * x, axis=0)
    nt2 = jnp.sum(t * t, axis=0)
    # max(sqrt(p), eps) == sqrt(max(p, eps^2)); rsqrt runs on the EUP slot.
    inv = jax.lax.rsqrt(jnp.maximum(nx2 * nt2, EPS * EPS))
    cos = dot * inv

    valid = None
    if needs_mask:
        blk = pl.program_id(1) * pi_ext + pi       # logical row-block index
        rid = jax.lax.broadcasted_iota(jnp.int32, (rows, 128), 0) + blk * rows
        valid = rid < r_valid
        cos = jnp.where(valid, cos, 0.0)

    cos_ref[...] += cos

    if has_mask:
        # binary_object_mask = mask.clamp(0, 1).long() == 1  <=>  mask >= 1
        bin_obj = m_ref[...].astype(jnp.float32) >= 1.0
        if needs_mask:
            bin_obj = jnp.logical_and(bin_obj, valid)
        bin_f = bin_obj.astype(jnp.float32)
        obj_ref[...] += cos * bin_f
        cnt_ref[...] += bin_f


def cosine_similarity_loss_with_mask(x, target, mask=None, weighted=False,
                                     *, _max_rows=None):
    """x, target: [N, C, H, W]; mask: [N, H, W] labels (any dtype) or None."""
    if weighted:
        # TODO(synk): weighted=True needs data-dependent torch.unique per-object
        # 1/num_pixels weighting; not implemented in the kernel.
        raise NotImplementedError("weighted=True is not supported")

    N, C, H, W = x.shape
    HW = H * W
    hw128 = -(-HW // 128) * 128
    R = hw128 // 128
    lane_pad = hw128 - HW

    xr = x.reshape(N, C, HW)
    tr = target.reshape(N, C, HW)
    if lane_pad:
        # TODO(synk): HW % 128 != 0 requires one lane-pad copy; padded pixels
        # (x = t = 0, mask = 0) contribute exactly 0 to every accumulator.
        xr = jnp.pad(xr, ((0, 0), (0, 0), (0, lane_pad)))
        tr = jnp.pad(tr, ((0, 0), (0, 0), (0, lane_pad)))
    xr = xr.reshape(N, C, R, 128)
    tr = tr.reshape(N, C, R, 128)

    has_mask = mask is not None
    if has_mask:
        mr = mask.reshape(N, HW)                   # native dtype, no host upcast
        if lane_pad:
            mr = jnp.pad(mr, ((0, 0), (0, lane_pad)))
        mr = mr.reshape(N, R, 128)
        m_item = mr.dtype.itemsize
    else:
        m_item = 0

    rows, pb, po, pi_ext, needs_mask, cap = _plan_tiling(
        R, C, x.dtype.itemsize, m_item, N, _max_rows)

    def in_idx(n, o, i):
        return (n, 0, jnp.minimum(o * pi_ext + i, pb - 1), 0)

    def m_idx(n, o, i):
        return (n, jnp.minimum(o * pi_ext + i, pb - 1), 0)

    acc_shape = jax.ShapeDtypeStruct((N, po, rows, 128), jnp.float32)
    acc_spec = pl.BlockSpec((None, None, rows, 128), lambda n, o, i: (n, o, 0, 0))

    in_specs = [pl.BlockSpec((None, C, rows, 128), in_idx),
                pl.BlockSpec((None, C, rows, 128), in_idx)]
    operands = [xr, tr]
    if has_mask:
        in_specs.append(pl.BlockSpec((None, rows, 128), m_idx))
        operands.append(mr)
        out_shape = (acc_shape, acc_shape, acc_shape)
        out_specs = (acc_spec, acc_spec, acc_spec)
    else:
        out_shape = acc_shape
        out_specs = acc_spec

    kernel = functools.partial(
        _cosine_kernel, has_mask=has_mask, rows=rows, r_valid=R,
        pi_ext=pi_ext, needs_mask=needs_mask)

    vmem_limit = int(max(32 * 1024 * 1024,
                         min(cap * 3 // 4, 100 * 1024 * 1024)))

    result = pl.pallas_call(
        kernel,
        out_shape=out_shape,
        grid=(N, po, pi_ext),
        in_specs=in_specs,
        out_specs=out_specs,
        compiler_params=pltpu.CompilerParams(
            dimension_semantics=("parallel", "parallel", "arbitrary"),
            vmem_limit_bytes=vmem_limit),
    )(*operands)

    n_pix = float(N * HW)
    if has_mask:
        cos_p, obj_p, cnt_p = result
        s_cos = jnp.sum(cos_p)
        s_obj = jnp.sum(obj_p)
        s_bin = jnp.sum(cnt_p)
        tot_temp = 0.5 * (n_pix - s_cos)           # sum of 0.5*(1-cos), all pixels
        obj_temp = 0.5 * (s_bin - s_obj)           # sum over object pixels
        bg_cnt = n_pix - s_bin
        bg_temp = tot_temp - obj_temp
        loss = jnp.where(s_bin > 0, obj_temp / jnp.maximum(s_bin, 1.0), 0.0)
        bg_loss = jnp.where(bg_cnt > 0,
                            0.1 * bg_temp / jnp.maximum(bg_cnt, 1.0), 0.0)
        return loss + bg_loss
    else:
        s_cos = jnp.sum(result)
        return 0.5 * (n_pix - s_cos) / (N * C * H * W)


def _reference(x, target, mask=None):
    """Pure-JAX re-implementation of the PyTorch forward (weighted=False)."""
    x = x.astype(jnp.float32)
    target = target.astype(jnp.float32)
    dot = jnp.sum(x * target, axis=1)
    nx = jnp.sqrt(jnp.sum(x * x, axis=1))
    nt = jnp.sqrt(jnp.sum(target * target, axis=1))
    cos = dot / jnp.maximum(nx * nt, EPS)
    temp = 0.5 * (1.0 - cos)                        # [N, H, W]
    if mask is None:
        return jnp.sum(temp) / target.size
    bin_obj = (jnp.clip(mask, 0.0, 1.0).astype(jnp.int32) == 1).astype(jnp.float32)
    bg = 1.0 - bin_obj
    loss = jnp.where(jnp.sum(bin_obj) > 0,
                     jnp.sum(temp * bin_obj) / jnp.maximum(jnp.sum(bin_obj), 1.0),
                     0.0)
    bg_loss = jnp.where(jnp.sum(bg) > 0,
                        0.1 * jnp.sum(temp * bg) / jnp.maximum(jnp.sum(bg), 1.0),
                        0.0)
    return loss + bg_loss


def _check(out, ref):
    np.testing.assert_allclose(np.asarray(out), np.asarray(ref),
                               rtol=1e-5, atol=1e-6)


if __name__ == "__main__":
    key = jax.random.PRNGKey(0)
    keys = jax.random.split(key, 12)

    # Case 1: HW multiple of 128, no padding, single block per image.
    N, C, H, W = 2, 4, 16, 16
    x = jax.random.normal(keys[0], (N, C, H, W), dtype=jnp.float32)
    t = jax.random.normal(keys[1], (N, C, H, W), dtype=jnp.float32)
    m = jax.random.randint(keys[2], (N, H, W), 0, 3).astype(jnp.float32)
    _check(jax.block_until_ready(cosine_similarity_loss_with_mask(x, t, m)),
           _reference(x, t, m))
    _check(jax.block_until_ready(cosine_similarity_loss_with_mask(x, t, None)),
           _reference(x, t, None))

    # Case 2: HW % 128 != 0 (lane-pad path).
    x2 = jax.random.normal(keys[3], (2, 4, 10, 10), dtype=jnp.float32)
    t2 = jax.random.normal(keys[4], (2, 4, 10, 10), dtype=jnp.float32)
    m2 = jax.random.randint(keys[5], (2, 10, 10), 0, 3).astype(jnp.float32)
    _check(jax.block_until_ready(cosine_similarity_loss_with_mask(x2, t2, m2)),
           _reference(x2, t2, m2))
    _check(jax.block_until_ready(cosine_similarity_loss_with_mask(x2, t2, None)),
           _reference(x2, t2, None))

    # Case 3: batch=1 (pixel-group split across 2 parallel blocks), int32 mask.
    x3 = jax.random.normal(keys[6], (1, 4, 64, 64), dtype=jnp.float32)
    t3 = jax.random.normal(keys[7], (1, 4, 64, 64), dtype=jnp.float32)
    m3 = jax.random.randint(keys[8], (1, 64, 64), 0, 4).astype(jnp.int32)
    _check(jax.block_until_ready(cosine_similarity_loss_with_mask(x3, t3, m3)),
           _reference(x3, t3, m3))

    # Case 4: forced small block -> ragged last row-block (in-kernel row mask).
    x4 = jax.random.normal(keys[9], (2, 4, 16, 80), dtype=jnp.float32)
    t4 = jax.random.normal(keys[10], (2, 4, 16, 80), dtype=jnp.float32)
    m4 = jax.random.randint(keys[11], (2, 16, 80), 0, 3).astype(jnp.float32)
    _check(jax.block_until_ready(
        cosine_similarity_loss_with_mask(x4, t4, m4, _max_rows=8)),
        _reference(x4, t4, m4))

    # Case 5: forced small block -> odd block count (clamped phantom block).
    x5 = jax.random.normal(keys[0], (2, 4, 24, 128), dtype=jnp.float32)
    t5 = jax.random.normal(keys[1], (2, 4, 24, 128), dtype=jnp.float32)
    m5 = jax.random.randint(keys[2], (2, 24, 128), 0, 3).astype(jnp.float32)
    _check(jax.block_until_ready(
        cosine_similarity_loss_with_mask(x5, t5, m5, _max_rows=8)),
        _reference(x5, t5, m5))

    print("KERNEL_OK")
</pallas_src>

<mosaic_0001>
module attributes {stable_mosaic.version = 11 : i64} {
  func.func @_cosine_kernel(%arg0: i32, %arg1: i32, %arg2: i32, %arg3: memref<1x4x2x128xf32, #tpu.memory_space<vmem>>, %arg4: memref<1x4x2x128xf32, #tpu.memory_space<vmem>>, %arg5: memref<1x2x128xf32, #tpu.memory_space<vmem>>, %arg6: memref<1x1x2x128xf32, #tpu.memory_space<vmem>>, %arg7: memref<1x1x2x128xf32, #tpu.memory_space<vmem>>, %arg8: memref<1x1x2x128xf32, #tpu.memory_space<vmem>>) attributes {dimension_semantics = [#tpu.dimension_semantics<parallel>, #tpu.dimension_semantics<parallel>, #tpu.dimension_semantics<arbitrary>], iteration_bounds = array<i64: 2, 1, 1>, scalar_prefetch = 0 : i64, scratch_operands = 0 : i64, tpu.core_type = #tpu.core_type<tc>, window_params = [{transform_indices = @transform_0, window_bounds = array<i64: 1, 4, 2, 128>}, {transform_indices = @transform_1, window_bounds = array<i64: 1, 4, 2, 128>}, {transform_indices = @transform_2, window_bounds = array<i64: 1, 2, 128>}, {transform_indices = @transform_3, window_bounds = array<i64: 1, 1, 2, 128>}, {transform_indices = @transform_4, window_bounds = array<i64: 1, 1, 2, 128>}, {transform_indices = @transform_5, window_bounds = array<i64: 1, 1, 2, 128>}]} {
    %c0_i32 = arith.constant 0 : i32
    %0 = arith.cmpi eq, %arg2, %c0_i32 : i32
    %1 = arith.extui %0 : i1 to i32
    %c0_i32_0 = arith.constant 0 : i32
    %2 = arith.cmpi ne, %1, %c0_i32_0 : i32
    scf.if %2 {
      %cst_39 = arith.constant 0.000000e+00 : f32
      %43 = vector.broadcast %cst_39 : f32 to vector<2x128xf32>
      %c0_40 = arith.constant 0 : index
      %c0_41 = arith.constant 0 : index
      %c0_42 = arith.constant 0 : index
      %c0_43 = arith.constant 0 : index
      %44 = vector.load %arg6[%c0_40, %c0_41, %c0_42, %c0_43] : memref<1x1x2x128xf32, #tpu.memory_space<vmem>>, vector<1x1x2x128xf32>
      %45 = vector.shape_cast %44 : vector<1x1x2x128xf32> to vector<2x128xf32>
      %46 = vector.shape_cast %43 : vector<2x128xf32> to vector<1x1x2x128xf32>
      tpu.vector_store %arg6[%c0_40, %c0_41, %c0_42, %c0_43], %46 {strides = array<i32>} : memref<1x1x2x128xf32, #tpu.memory_space<vmem>>, vector<1x1x2x128xf32>,
      %cst_44 = arith.constant 0.000000e+00 : f32
      %47 = vector.broadcast %cst_44 : f32 to vector<2x128xf32>
      %c0_45 = arith.constant 0 : index
      %c0_46 = arith.constant 0 : index
      %c0_47 = arith.constant 0 : index
      %c0_48 = arith.constant 0 : index
      %48 = vector.load %arg7[%c0_45, %c0_46, %c0_47, %c0_48] : memref<1x1x2x128xf32, #tpu.memory_space<vmem>>, vector<1x1x2x128xf32>
      %49 = vector.shape_cast %48 : vector<1x1x2x128xf32> to vector<2x128xf32>
      %50 = vector.shape_cast %47 : vector<2x128xf32> to vector<1x1x2x128xf32>
      tpu.vector_store %arg7[%c0_45, %c0_46, %c0_47, %c0_48], %50 {strides = array<i32>} : memref<1x1x2x128xf32, #tpu.memory_space<vmem>>, vector<1x1x2x128xf32>,
      %cst_49 = arith.constant 0.000000e+00 : f32
      %51 = vector.broadcast %cst_49 : f32 to vector<2x128xf32>
      %c0_50 = arith.constant 0 : index
      %c0_51 = arith.constant 0 : index
      %c0_52 = arith.constant 0 : index
      %c0_53 = arith.constant 0 : index
      %52 = vector.load %arg8[%c0_50, %c0_51, %c0_52, %c0_53] : memref<1x1x2x128xf32, #tpu.memory_space<vmem>>, vector<1x1x2x128xf32>
      %53 = vector.shape_cast %52 : vector<1x1x2x128xf32> to vector<2x128xf32>
      %54 = vector.shape_cast %51 : vector<2x128xf32> to vector<1x1x2x128xf32>
      tpu.vector_store %arg8[%c0_50, %c0_51, %c0_52, %c0_53], %54 {strides = array<i32>} : memref<1x1x2x128xf32, #tpu.memory_space<vmem>>, vector<1x1x2x128xf32>,
    } else {
    }
    %c0 = arith.constant 0 : index
    %c0_1 = arith.constant 0 : index
    %c0_2 = arith.constant 0 : index
    %c0_3 = arith.constant 0 : index
    %3 = vector.load %arg3[%c0, %c0_1, %c0_2, %c0_3] : memref<1x4x2x128xf32, #tpu.memory_space<vmem>>, vector<1x4x2x128xf32>
    %4 = vector.shape_cast %3 : vector<1x4x2x128xf32> to vector<4x2x128xf32>
    %c0_4 = arith.constant 0 : index
    %c0_5 = arith.constant 0 : index
    %c0_6 = arith.constant 0 : index
    %c0_7 = arith.constant 0 : index
    %5 = vector.load %arg4[%c0_4, %c0_5, %c0_6, %c0_7] : memref<1x4x2x128xf32, #tpu.memory_space<vmem>>, vector<1x4x2x128xf32>
    %6 = vector.shape_cast %5 : vector<1x4x2x128xf32> to vector<4x2x128xf32>
    %7 = arith.mulf %4, %6 : vector<4x2x128xf32>
    %cst = arith.constant dense<0.000000e+00> : vector<2x128xf32>
    %8 = vector.multi_reduction <add>, %7, %cst [0] : vector<4x2x128xf32> to vector<2x128xf32>
    %9 = arith.mulf %4, %4 : vector<4x2x128xf32>
    %cst_8 = arith.constant dense<0.000000e+00> : vector<2x128xf32>
    %10 = vector.multi_reduction <add>, %9, %cst_8 [0] : vector<4x2x128xf32> to vector<2x128xf32>
    %11 = arith.mulf %6, %6 : vector<4x2x128xf32>
    %cst_9 = arith.constant dense<0.000000e+00> : vector<2x128xf32>
    %12 = vector.multi_reduction <add>, %11, %cst_9 [0] : vector<4x2x128xf32> to vector<2x128xf32>
    %13 = arith.mulf %10, %12 : vector<2x128xf32>
    %cst_10 = arith.constant 1.000000e-16 : f32
    %14 = vector.broadcast %cst_10 : f32 to vector<2x128xf32>
    %15 = arith.maximumf %13, %14 : vector<2x128xf32>
    %16 = math.rsqrt %15 : vector<2x128xf32>
    %17 = arith.mulf %8, %16 : vector<2x128xf32>
    %c0_11 = arith.constant 0 : index
    %c0_12 = arith.constant 0 : index
    %c0_13 = arith.constant 0 : index
    %c0_14 = arith.constant 0 : index
    %18 = vector.load %arg6[%c0_11, %c0_12, %c0_13, %c0_14] : memref<1x1x2x128xf32, #tpu.memory_space<vmem>>, vector<1x1x2x128xf32>
    %19 = vector.shape_cast %18 : vector<1x1x2x128xf32> to vector<2x128xf32>
    %20 = arith.addf %19, %17 : vector<2x128xf32>
    %c0_15 = arith.constant 0 : index
    %c0_16 = arith.constant 0 : index
    %c0_17 = arith.constant 0 : index
    %c0_18 = arith.constant 0 : index
    %21 = vector.load %arg6[%c0_15, %c0_16, %c0_17, %c0_18] : memref<1x1x2x128xf32, #tpu.memory_space<vmem>>, vector<1x1x2x128xf32>
    %22 = vector.shape_cast %21 : vector<1x1x2x128xf32> to vector<2x128xf32>
    %23 = vector.shape_cast %20 : vector<2x128xf32> to vector<1x1x2x128xf32>
    tpu.vector_store %arg6[%c0_15, %c0_16, %c0_17, %c0_18], %23 {strides = array<i32>} : memref<1x1x2x128xf32, #tpu.memory_space<vmem>>, vector<1x1x2x128xf32>,
    %c0_19 = arith.constant 0 : index
    %c0_20 = arith.constant 0 : index
    %c0_21 = arith.constant 0 : index
    %24 = vector.load %arg5[%c0_19, %c0_20, %c0_21] : memref<1x2x128xf32, #tpu.memory_space<vmem>>, vector<1x2x128xf32>
    %25 = vector.shape_cast %24 : vector<1x2x128xf32> to vector<2x128xf32>
    %cst_22 = arith.constant 1.000000e+00 : f32
    %26 = vector.broadcast %cst_22 : f32 to vector<2x128xf32>
    %27 = arith.cmpf oge, %25, %26 : vector<2x128xf32>
    %28 = arith.extui %27 : vector<2x128xi1> to vector<2x128xi32>
    %29 = arith.sitofp %28 : vector<2x128xi32> to vector<2x128xf32>
    %c0_23 = arith.constant 0 : index
    %c0_24 = arith.constant 0 : index
    %c0_25 = arith.constant 0 : index
    %c0_26 = arith.constant 0 : index
    %30 = vector.load %arg7[%c0_23, %c0_24, %c0_25, %c0_26] : memref<1x1x2x128xf32, #tpu.memory_space<vmem>>, vector<1x1x2x128xf32>
    %31 = vector.shape_cast %30 : vector<1x1x2x128xf32> to vector<2x128xf32>
    %32 = arith.mulf %17, %29 : vector<2x128xf32>
    %33 = arith.addf %31, %32 : vector<2x128xf32>
    %c0_27 = arith.constant 0 : index
    %c0_28 = arith.constant 0 : index
    %c0_29 = arith.constant 0 : index
    %c0_30 = arith.constant 0 : index
    %34 = vector.load %arg7[%c0_27, %c0_28, %c0_29, %c0_30] : memref<1x1x2x128xf32, #tpu.memory_space<vmem>>, vector<1x1x2x128xf32>
    %35 = vector.shape_cast %34 : vector<1x1x2x128xf32> to vector<2x128xf32>
    %36 = vector.shape_cast %33 : vector<2x128xf32> to vector<1x1x2x128xf32>
    tpu.vector_store %arg7[%c0_27, %c0_28, %c0_29, %c0_30], %36 {strides = array<i32>} : memref<1x1x2x128xf32, #tpu.memory_space<vmem>>, vector<1x1x2x128xf32>,
    %c0_31 = arith.constant 0 : index
    %c0_32 = arith.constant 0 : index
    %c0_33 = arith.constant 0 : index
    %c0_34 = arith.constant 0 : index
    %37 = vector.load %arg8[%c0_31, %c0_32, %c0_33, %c0_34] : memref<1x1x2x128xf32, #tpu.memory_space<vmem>>, vector<1x1x2x128xf32>
    %38 = vector.shape_cast %37 : vector<1x1x2x128xf32> to vector<2x128xf32>
    %39 = arith.addf %38, %29 : vector<2x128xf32>
    %c0_35 = arith.constant 0 : index
    %c0_36 = arith.constant 0 : index
    %c0_37 = arith.constant 0 : index
    %c0_38 = arith.constant 0 : index
    %40 = vector.load %arg8[%c0_35, %c0_36, %c0_37, %c0_38] : memref<1x1x2x128xf32, #tpu.memory_space<vmem>>, vector<1x1x2x128xf32>
    %41 = vector.shape_cast %40 : vector<1x1x2x128xf32> to vector<2x128xf32>
    %42 = vector.shape_cast %39 : vector<2x128xf32> to vector<1x1x2x128xf32>
    tpu.vector_store %arg8[%c0_35, %c0_36, %c0_37, %c0_38], %42 {strides = array<i32>} : memref<1x1x2x128xf32, #tpu.memory_space<vmem>>, vector<1x1x2x128xf32>,
    return
  }
  func.func @transform_0(%arg0: i32, %arg1: i32, %arg2: i32) -> (i32, i32, i32, i32) {
    %c1_i32 = arith.constant 1 : i32
    %0 = arith.muli %arg1, %c1_i32 : i32
    %1 = arith.addi %0, %arg2 : i32
    %c0_i32 = arith.constant 0 : i32
    %2 = arith.minsi %1, %c0_i32 : i32
    %c0_i32_0 = arith.constant 0 : i32
    %c0_i32_1 = arith.constant 0 : i32
    %c0_i32_2 = arith.constant 0 : i32
    return %arg0, %c0_i32_0, %2, %c0_i32_1 : i32, i32, i32, i32
  }
  func.func @transform_1(%arg0: i32, %arg1: i32, %arg2: i32) -> (i32, i32, i32, i32) {
    %c1_i32 = arith.constant 1 : i32
    %0 = arith.muli %arg1, %c1_i32 : i32
    %1 = arith.addi %0, %arg2 : i32
    %c0_i32 = arith.constant 0 : i32
    %2 = arith.minsi %1, %c0_i32 : i32
    %c0_i32_0 = arith.constant 0 : i32
    %c0_i32_1 = arith.constant 0 : i32
    %c0_i32_2 = arith.constant 0 : i32
    return %arg0, %c0_i32_0, %2, %c0_i32_1 : i32, i32, i32, i32
  }
  func.func @transform_2(%arg0: i32, %arg1: i32, %arg2: i32) -> (i32, i32, i32) {
    %c1_i32 = arith.constant 1 : i32
    %0 = arith.muli %arg1, %c1_i32 : i32
    %1 = arith.addi %0, %arg2 : i32
    %c0_i32 = arith.constant 0 : i32
    %2 = arith.minsi %1, %c0_i32 : i32
    %c0_i32_0 = arith.constant 0 : i32
    %c0_i32_1 = arith.constant 0 : i32
    return %arg0, %2, %c0_i32_0 : i32, i32, i32
  }
  func.func @transform_3(%arg0: i32, %arg1: i32, %arg2: i32) -> (i32, i32, i32, i32) {
    %c0_i32 = arith.constant 0 : i32
    %c0_i32_0 = arith.constant 0 : i32
    %c0_i32_1 = arith.constant 0 : i32
    return %arg0, %arg1, %c0_i32, %c0_i32_0 : i32, i32, i32, i32
  }
  func.func @transform_4(%arg0: i32, %arg1: i32, %arg2: i32) -> (i32, i32, i32, i32) {
    %c0_i32 = arith.constant 0 : i32
    %c0_i32_0 = arith.constant 0 : i32
    %c0_i32_1 = arith.constant 0 : i32
    return %arg0, %arg1, %c0_i32, %c0_i32_0 : i32, i32, i32, i32
  }
  func.func @transform_5(%arg0: i32, %arg1: i32, %arg2: i32) -> (i32, i32, i32, i32) {
    %c0_i32 = arith.constant 0 : i32
    %c0_i32_0 = arith.constant 0 : i32
    %c0_i32_1 = arith.constant 0 : i32
    return %arg0, %arg1, %c0_i32, %c0_i32_0 : i32, i32, i32, i32
  }
}

</mosaic_0001>

<bundles_post_ra>
// kernel: tpu_custom_call.1
= control target key start
LH: loop header
LB: loop body
LE: loop exit
PB: predicated region body
PF: predicated region fallthrough
CT: control target
= control target key end

     0   :  { %s1373_s0 = inlined_call_operand.hbm [shape: f32[2,4,2,128], index: 0, kind: input, shape index: {}]   ;;  %s1374_s1 = inlined_call_operand.hbm [shape: f32[2,4,2,128], index: 1, kind: input, shape index: {}]   ;;  %s1375_s2 = inlined_call_operand.hbm [shape: f32[2,2,128], index: 2, kind: input, shape index: {}]   ;;  %s1376_s3 = inlined_call_operand.hbm [shape: f32[2,1,2,128], index: 3, kind: output, shape index: {0}]   ;;  %s1377_s4 = inlined_call_operand.hbm [shape: f32[2,1,2,128], index: 4, kind: output, shape index: {1}]   ;;  %s1378_s5 = inlined_call_operand.hbm [shape: f32[2,1,2,128], index: 5, kind: output, shape index: {2}]  }
   0x1   :  { %1390 = sst [smem:[#allocation23_spill]] %s1374_s1 }
   0x2   :  { %1391 = sst [smem:[#allocation24_spill]] %s1377_s4 }
   0x3   :  { %1392 = sst [smem:[#allocation25_spill]] %s1378_s5 }
   0x4   :  { %11 = vsyncpa [#allocation3], 0 }
   0x5   :  { %13 = vsyncpa [#allocation3 + $0x1], 0 }
   0x6   :  { %14 = vsyncpa [#allocation6], 0 }
   0x7   :  { %16 = vsyncpa [#allocation6 + $0x1], 0 }
   0x8   :  { %17 = vsyncpa [#allocation4], 0 }
   0x9   :  { %19 = vsyncpa [#allocation4 + $0x1], 0 }
   0xa   :  { %20 = vsyncpa [#allocation10], 0 }
   0xb   :  { %22 = vsyncpa [#allocation10 + $0x1], 0  ;;  %s1127_s18 = smov 0   ;;  %s1129_s19 = smov 0  }
   0xc   :  { %s1131_s20 = smov 0   ;;  %s1133_s21 = smov 0  }
   0xd   :  { %s1135_s22 = smov 0   ;;  %s1137_s23 = smov 0  }
   0xe LB: > { %1393 = sst [smem:[#allocation16_spill]] %s1072_s18  ;;  %s1158_s24 = sadd.s32 4294967295, %s1092_s23   ;;  %s1092_s23 = sphi %s1137_s23, %s28_s23   ;;  %s1088_s22 = sphi %s1135_s22, %s1420_s22   ;;  %s1084_s21 = sphi %s1133_s21, %s1419_s21   ;;  %s1080_s20 = sphi %s1131_s20, %s1415_s20   ;;  %s1076_s19 = sphi %s1129_s19, %s1418_s19   ;;  %s1072_s18 = sphi %s1127_s18, %s1417_s18  }
   0xf   : > { %1394 = sst [smem:[#allocation17_spill]] %s1080_s20  ;;  %s1379_s25 = sadd.s32 4294967294, %s1092_s23  }
  0x10   : > { %1395 = sst [smem:[#allocation18_spill]] %s1092_s23  ;;  %s47_s26 = sadd.s32 1, %s1088_s22 }
  0x11   : > { %s62_s27 = sadd.s32 1, %s1080_s20  ;;  %p49_p0 = scmp.ge.s32.totalorder %s47_s26, 2 }
  0x12   : > { %p69_p1 = scmp.ne.s32.totalorder %s1080_s20, %s1076_s19  ;;  %p70_p2 = scmp.eq.s32.totalorder %s1092_s23, 0 }
  0x13   : > { %p75_p3 = scmp.ne.s32.totalorder %s1076_s19, %s1072_s18  ;;  %s1422_s26 = smov (%p49_p0, %s47_s26), 0 }
  0x14   : > { %1396 = sst [smem:[#allocation19_spill]] %s1422_s26  ;;  %p1170_p4 = por %p70_p2, %p69_p1 }
  0x15   : > { %p76_p5 = scmp.eq.s32.totalorder %s1158_s24, 0  ;;  %s57_s29 = ssub.s32 %s1088_s22, %s1422_s26 }
  0x16   : > { %p169_p6 = scmp.eq.s32.totalorder %s1158_s24, 1  ;;  %p60_p7 = scmp.eq.s32.totalorder %s57_s29, 0 }
  0x17   : > { %p1178_p8 = por %p76_p5, %p75_p3  ;;  %p175_p10 = scmp.eq.s32.totalorder %s1379_s25, 1 }
  0x18   : > { %p1182_p9 = por %p169_p6, %p69_p1  ;;  %p742_p12 = scmp.ge.s32.totalorder %s1092_s23, 2 }
  0x19   : > { %s1189_s7 = scalar_select %p60_p7, %s1080_s20, %s62_s27  }
  0x1a   : > { %s1399_s6 = scalar_select %p1182_p9, 1, 0 }
  0x1b   : > { %1401 = sst [smem:[#allocation21_spill]] %s1189_s7  ;;  %p1191_p11 = por %p175_p10, %p75_p3 }
  0x1c   : > { %1400 = sst [smem:[#allocation20_spill]] %s1399_s6  ;;  %p801_p13 = scmp.lt.s32.totalorder %s1092_s23, 2 }
  0x1d   : > { %s1402_s8 = scalar_select %p1191_p11, 1, 0 }
  0x1e   : > { %s1198_s9 = sand.u32 1, %s1080_s20   ;;  %s767_s11 = sshll.u32 %s1088_s22, 3 }
  0x1f   : > { %1403 = sst [smem:[#allocation22_spill]] %s1402_s8  ;;  %s743_s10 = sshll.u32 %s1198_s9, 3 }
  0x20   : > { %p1204_p0 = pnand %p801_p13, %p1170_p4  ;;  %s277_s13 = sand.u32 1, %s1092_s23  }
  0x21   : > { %s1405_s1 = sld [smem:[#allocation23_spill]]  ;;  %s281_s27 = scalar_lea.vmem [#allocation5], %s743_s10 }
  0x22   : > { %s293_s29 = sshll.u32 %s281_s27, 4  ;;  %s278_s25 = scalar_lea.sflag [#allocation6], %s277_s13  ;;  %s294_s29 = int_to_ptr.vmem [resolvable:$true] %s293_s29 }
  0x23   : > { %s1094_s28 = smov 32   ;;  %s1095_s26 = smov 2  }
  0x24   : > { %p751_p1 = scmp.ge.s32.totalorder %s1092_s23, 1  ;;  %p324_p2 = scmp.lt.s32.totalorder %s1092_s23, 3 }
  0x25   : > { %s252_s13 = scalar_lea.sflag [#allocation3], %s1198_s9 }
  0x26   : > { %p1216_p3 = pnand %p751_p1, %p324_p2 }
  0x27   : > { %s290_s16 = scalar_lea.hbm %s1405_s1, %s767_s11  ;;  %s255_s1 = scalar_lea.vmem [#allocation2], %s743_s10 }
  0x28   : > { %s291_s17 = sshll.u32 %s290_s16, 4  ;;  %s264_s16 = scalar_lea.hbm %s1373_s0, %s767_s11  ;;  %s292_s17 = int_to_ptr.hbm [resolvable:$true] %s291_s17 }
  0x29   : > { %787 = dma.hbm_to_vmem [thread:$0]  (!%p1204_p0), %s292_s17, 128, %s294_s29, %s278_s25, %s1094_s28, %s1094_s28, %s1095_s26  }
  0x2a   : > { %s265_s27 = sshll.u32 %s264_s16, 4  ;;  %s267_s20 = sshll.u32 %s255_s1, 4  ;;  %s266_s27 = int_to_ptr.hbm [resolvable:$true] %s265_s27  ;;  %s268_s20 = int_to_ptr.vmem [resolvable:$true] %s267_s20 }
  0x2b   : > { %784 = dma.hbm_to_vmem [thread:$0]  (!%p1204_p0), %s266_s27, 128, %s268_s20, %s252_s13, %s1094_s28, %s1094_s28, %s1095_s26  }
  0x2c   : > { %s749_s17 = sshll.u32 %s1198_s9, 1  ;;  %s750_s29 = sshll.u32 %s1088_s22, 1 }
  0x2d   : > { %s315_s18 = scalar_lea.hbm %s1375_s2, %s750_s29  ;;  %s307_s5 = scalar_lea.vmem [#allocation7], %s749_s17 }
  0x2e   : > { %s317_s6 = sshll.u32 %s315_s18, 4  ;;  %s319_s4 = sshll.u32 %s307_s5, 4  ;;  %s318_s6 = int_to_ptr.hbm [resolvable:$true] %s317_s6  ;;  %s320_s4 = int_to_ptr.vmem [resolvable:$true] %s319_s4 }
  0x2f   : > { %790 = dma.hbm_to_vmem [thread:$0]  (!%p1204_p0), %s318_s6, 32, %s320_s4, %s278_s25  }
  0x30   : > { %328 = sbr.rel (%p1216_p3) target bundleno = 123 (0x7b), region = 32  ;;  %s1236_s1 = sand.u32 (!%p1216_p3), 1, %s1076_s19  }
  0x31   : > { %s752_s20 = sshll.u32 (!%p1216_p3), %s1236_s1, 3  ;;  %s331_s26 = scalar_lea.sflag (!%p1216_p3), [#allocation3], %s1236_s1 }
  0x32   : > { %s334_s23 = scalar_lea.vmem (!%p1216_p3), [#allocation2], %s752_s20 }
  0x35   : > { %1055 = dma.done.wait (%p1178_p8), %s331_s26, 128  }
  0x36   : > { %1057 = vsyncadd (%p1178_p8), %s331_s26, 4294967168  ;;  %s340_s4 = sand.u32 1, %s1158_s24   ;;  %s344_s18 = scalar_lea.vmem [#allocation5], %s752_s20 }
  0x37   : > { %s341_s5 = scalar_lea.sflag [#allocation6], %s340_s4 }
  0x38   : > { %1059 = dma.done.wait (%p1178_p8), %s341_s5, 160  }
  0x39   : > { %1061 = vsyncadd (%p1178_p8), %s341_s5, 4294967136  ;;  %s754_s25 = sshll.u32 %s1236_s1, 1  ;;  %v1096_v0 = vmov 0.0   ;;  %vm430_vm0 = vcmask 1041408   ;;  %v418_v1 = vld [vmem:[%s334_s23] sm:$0x3] }
  0x3a   : > { %s1252_s6 = scalar_lea.vmem [#allocation9], %s754_s25  ;;  %s1255_s7 = scalar_lea.vmem [#allocation8], %s754_s25  ;;  %v419_v2 = vld [vmem:[%s334_s23 + $0x2] sm:$0x3]  ;;  %v420_v3 = vld [vmem:[%s334_s23 + $0x4] sm:$0x3]  ;;  %v438_v6 = vmul.f32 %v418_v1, %v418_v1 }
  0x3b   : > { %416 = vst [vmem:[%s1252_s6] sm:$0x3] %v1096_v0  ;;  %s1258_s8 = scalar_lea.vmem [#allocation11], %s754_s25  ;;  %v421_v4 = vld [vmem:[%s334_s23 + $0x6] sm:$0x3]  ;;  %v422_v5 = vld [vmem:[%s344_s18] sm:$0x3]  ;;  %v439_v7 = vmul.f32 %v419_v2, %v419_v2  ;;  %v440_v8 = vmul.f32 %v420_v3, %v420_v3 }
  0x3c   : > { %415 = vst [vmem:[%s1255_s7] sm:$0x3] %v1096_v0  ;;  %v423_v9 = vld [vmem:[%s344_s18 + $0x2] sm:$0x3]  ;;  %v424_v10 = vld [vmem:[%s344_s18 + $0x4] sm:$0x3]  ;;  %v442_v12 = vsel %vm430_vm0, %v438_v6, 0.0  ;;  %v449_v14 = vmul.f32 %v422_v5, %v422_v5  ;;  %v441_v15 = vmul.f32 %v421_v4, %v421_v4  ;;  %v426_v37 = vmul.f32 %v422_v5, %v418_v1 }
  0x3d   : > { %417 = vst [vmem:[%s1258_s8] sm:$0x3] %v1096_v0  ;;  %v425_v11 = vld [vmem:[%s344_s18 + $0x6] sm:$0x3]  ;;  %v443_v13 = vsel %vm430_vm0, %v439_v7, 0.0  ;;  %v445_v17 = vsel %vm430_vm0, %v440_v8, 0.0  ;;  %s354_s30 = scalar_lea.vmem [#allocation7], %s754_s25  ;;  %v450_v19 = vmul.f32 %v423_v9, %v423_v9  ;;  %v451_v20 = vmul.f32 %v424_v10, %v424_v10 }
  0x3e   : > { %v444_v16 = vadd.f32 %v443_v13, %v442_v12  ;;  %v476_v18 = vld [vmem:[%s354_s30] sm:$0x3]  ;;  %v452_v21 = vmul.f32 %v425_v11, %v425_v11  ;;  %v453_v23 = vsel %vm430_vm0, %v449_v14, 0.0  ;;  %v447_v24 = vsel %vm430_vm0, %v441_v15, 0.0  ;;  %s762_s9 = sshll.u32 %s1084_s21, 1  ;;  %s1407_s15 = sld [smem:[#allocation24_spill]] }
  0x3f   : > { %vm477_vm1 = vcmp.ge.f32.partialorder %v476_v18, 1.0  ;;  %v454_v25 = vsel %vm430_vm0, %v450_v19, 0.0  ;;  %v456_v26 = vsel %vm430_vm0, %v451_v20, 0.0  ;;  %v427_v38 = vmul.f32 %v423_v9, %v419_v2  ;;  %s509_s12 = scalar_lea.hbm %s1376_s3, %s762_s9  ;;  %s541_s27 = sshll.u32 %s1258_s8, 4  ;;  %s1297_s27 = int_to_ptr.vmem [resolvable:$true] %s541_s27 }
  0x40   : > { %v446_v22 = vadd.f32 %v445_v17, %v444_v16  ;;  %v455_v27 = vadd.f32 %v454_v25, %v453_v23  ;;  %v758_v28 = vsel %vm477_vm1, 1.0, %v1096_v0  ;;  %v458_v30 = vsel %vm430_vm0, %v452_v21, 0.0  ;;  %s1408_s29 = sld [smem:[#allocation25_spill]]  ;;  %s511_s21 = sshll.u32 %s1255_s7, 4  ;;  %s512_s21 = int_to_ptr.vmem [resolvable:$true] %s511_s21 }
  0x41   : > { %v428_v39 = vmul.f32 %v424_v10, %v420_v3  ;;  %v431_v40 = vsel %vm430_vm0, %v426_v37, 0.0  ;;  %v432_v41 = vsel %vm430_vm0, %v427_v38, 0.0  ;;  %v429_v44 = vmul.f32 %v425_v11, %v421_v4  ;;  %s1288_s26 = sshll.u32 %s509_s12, 4  ;;  %s526_s23 = sshll.u32 %s1252_s6, 4  ;;  %s514_s26 = int_to_ptr.hbm [resolvable:$true] %s1288_s26  ;;  %s1299_s23 = int_to_ptr.vmem [resolvable:$true] %s526_s23 }
  0x42   : > { %v448_v32 = vadd.f32 %v447_v24, %v446_v22  ;;  %v457_v33 = vadd.f32 %v456_v26, %v455_v27  ;;  %v433_v43 = vadd.f32 %v432_v41, %v431_v40  ;;  %v480_v57 = vld [vmem:[%s1252_s6] sm:$0x3]  ;;  %s960_s30 = sshra.s32 %s514_s26, 4  ;;  %s966_s12 = scalar_lea.hbm %s1376_s3, 4  ;;  %s961_s30 = int_to_ptr.hbm [resolvable:$true] %s960_s30 }
  0x43   : > { %v434_v45 = vsel %vm430_vm0, %v428_v39, 0.0  ;;  %v436_v49 = vsel %vm430_vm0, %v429_v44, 0.0  ;;  %v473_v55 = vld [vmem:[%s1255_s7] sm:$0x3]  ;;  %p967_p7 = scmp.lt.s32.totalorder %s961_s30, %s1376_s3 }
  0x44   : > { %v484_v29 = vld [vmem:[%s1258_s8] sm:$0x3]  ;;  %v459_v34 = vadd.f32 %v458_v30, %v457_v33  ;;  %v435_v48 = vadd.f32 %v434_v45, %v433_v43  ;;  %s524_s16 = scalar_lea.hbm %s1407_s15, %s762_s9 }
  0x45   : > { %v485_v31 = vadd.f32 %v758_v28, %v484_v29  ;;  %s1291_s5 = sshll.u32 %s524_s16, 4  ;;  %s529_s5 = int_to_ptr.hbm [resolvable:$true] %s1291_s5 }
  0x46   : > { %v460_v35 = vmul.f32 %v459_v34, %v448_v32  ;;  %v437_v52 = vadd.f32 %v436_v49, %v435_v48  ;;  %s539_s20 = scalar_lea.hbm %s1408_s29, %s762_s9  ;;  %s962_s9 = scalar_lea.hbm %s961_s30, 2 }
  0x47   : > { %486 = vst [vmem:[%s1258_s8] sm:$0x3] %v485_v31  ;;  %s1294_s18 = sshll.u32 %s539_s20, 4  ;;  %s488_s8 = scalar_lea.sflag [#allocation4], %s1236_s1  ;;  %s544_s18 = int_to_ptr.hbm [resolvable:$true] %s1294_s18 }
  0x48   : > { %v461_v36 = vmax.f32 %v460_v35, 1e-16  ;;  %p963_p4 = scmp.ne.s32.totalorder %s961_s30, %s962_s9  ;;  %p968_p8 = scmp.lt.s32.totalorder %s966_s12, %s962_s9 }
  0x4a   : > { %854 = vrsqrt.f32 %v461_v36  ;;  %vm468_vm2 = vweird.f32 %v461_v36  ;;  %p964_p5 = pnand %p963_p4, %p1182_p9  ;;  %p969_p10 = por %p968_p8, %p967_p7 }
  0x4c   : > { %p965_p6 = pneg %p964_p5 }
  0x4e   : > { %p970_p13 = pnand %p969_p10, %p965_p6 }
  0x50   : > { %v855_v42 = vpop.eup %854 }
  0x51   : > { %v463_v46 = vmul.f32 %v855_v42, %v461_v36  ;;  %vm469_vm3 = vweird.f32 %v855_v42 }
  0x52   : > { %vm470_vm4 = vmor %vm468_vm2, %vm469_vm3 }
  0x53   : > { %v464_v47 = vmul.f32 %v855_v42, %v463_v46 }
  0x55   : > { %v465_v50 = vmul.f32 0.5, %v464_v47 }
  0x57   : > { %v466_v51 = vsub.f32 1.5, %v465_v50 }
  0x59   : > { %v467_v53 = vmul.f32 %v855_v42, %v466_v51 }
  0x5b   : > { %v471_v54 = vsel %vm470_vm4, %v855_v42, %v467_v53 }
  0x5c   : > { %v472_v56 = vmul.f32 %v471_v54, %v437_v52 }
  0x5e   : > { %v481_v58 = vmul.f32 %v758_v28, %v472_v56  ;;  %v474_v59 = vadd.f32 %v473_v55, %v472_v56 }
  0x60   : > { %v482_v60 = vadd.f32 %v481_v58, %v480_v57  ;;  %475 = vst [vmem:[%s1255_s7] sm:$0x3] %v474_v59 }
  0x61   : > { %973 = shalt.err (!%p970_p13)
}
  0x62   : > { %775 = dma.vmem_to_hbm [thread:$0]  (%p1182_p9), %s512_s21, 32, %s514_s26, %s488_s8   ;;  %483 = vst [vmem:[%s1252_s6] sm:$0x3] %v482_v60 }
  0x63   : > { %s493_s1 = scalar_lea.sflag [#allocation10], %s340_s4  ;;  %s988_s7 = sshra.s32 %s529_s5, 4  ;;  %s989_s7 = int_to_ptr.hbm [resolvable:$true] %s988_s7 }
  0x64   : > { %s990_s16 = scalar_lea.hbm %s989_s7, 2  ;;  %s994_s20 = scalar_lea.hbm %s1407_s15, 4 }
  0x65   : > { %p991_p0 = scmp.ne.s32.totalorder %s989_s7, %s990_s16  ;;  %p995_p3 = scmp.lt.s32.totalorder %s989_s7, %s1407_s15 }
  0x66   : > { %p996_p4 = scmp.lt.s32.totalorder %s994_s20, %s990_s16 }
  0x67   : > { %p992_p1 = pnand %p991_p0, %p1182_p9 }
  0x68   : > { %p997_p5 = por %p996_p4, %p995_p3 }
  0x69   : > { %p993_p2 = pneg %p992_p1 }
  0x6b   : > { %p998_p6 = pnand %p997_p5, %p993_p2 }
  0x6d   : > { %1001 = shalt.err (!%p998_p6)
}
  0x6e   : > { %776 = dma.vmem_to_hbm [thread:$0]  (%p1182_p9), %s1299_s23, 32, %s529_s5, %s493_s1  }
  0x6f   : > { %s1016_s24 = sshra.s32 %s544_s18, 4  ;;  %s1022_s26 = scalar_lea.hbm %s1408_s29, 4  ;;  %s1017_s24 = int_to_ptr.hbm [resolvable:$true] %s1016_s24 }
  0x70   : > { %s1018_s4 = scalar_lea.hbm %s1017_s24, 2  ;;  %p1023_p13 = scmp.lt.s32.totalorder %s1017_s24, %s1408_s29 }
  0x71   : > { %p1019_p7 = scmp.ne.s32.totalorder %s1017_s24, %s1018_s4  ;;  %p1024_p0 = scmp.lt.s32.totalorder %s1022_s26, %s1018_s4 }
  0x73   : > { %p1020_p8 = pnand %p1019_p7, %p1182_p9  ;;  %p1025_p1 = por %p1024_p0, %p1023_p13 }
  0x75   : > { %p1021_p10 = pneg %p1020_p8 }
  0x77   : > { %p1026_p2 = pnand %p1025_p1, %p1021_p10 }
  0x79   : > { %1029 = shalt.err (!%p1026_p2)
}
  0x7a   : > { %777 = dma.vmem_to_hbm [thread:$0]  (%p1182_p9), %s1297_s27, 32, %s544_s18, %s493_s1  }
  0x7b PF: > { %s1410_s23 = sld [smem:[#allocation16_spill]]  ;;  %p792_p3 = pnand %p742_p12, %p1191_p11 }
  0x7c   : > { %s1412_s11 = sld [smem:[#allocation18_spill]] }
  0x7d   : > { %p793_p4 = pneg %p792_p3 }
  0x81   : > { %s555_s12 = sand.u32 1, %s1410_s23  }
  0x82   : > { %s556_s28 = scalar_lea.sflag [#allocation4], %s555_s12 }
  0x83   : > { %1063 = dma.done.wait (%p793_p4), %s556_s28, 32  }
  0x84   : > { %1065 = vsyncadd (%p793_p4), %s556_s28, 4294967264  ;;  %s1413_s14 = sadd.s32 4294967294, %s1412_s11  }
  0x85   : > { %s565_s7 = sand.u32 1, %s1413_s14  }
  0x86   : > { %s566_s25 = scalar_lea.sflag [#allocation10], %s565_s7 }
  0x87   : > { %1067 = dma.done.wait (%p793_p4), %s566_s25, 64  }
  0x88   : > { %1069 = vsyncadd (%p793_p4), %s566_s25, 4294967232  ;;  %s28_s23 = sadd.s32 1, %s1412_s11   ;;  %s1414_s27 = sld [smem:[#allocation17_spill]] }
  0x89   : > { %p25_p9 = scmp.ge.s32.totalorder %s28_s23, 4   ;;  %s1415_s20 = sld [smem:[#allocation21_spill]] }
  0x8a   : > { %s1416_s1 = sld [smem:[#allocation19_spill]]  ;;  %s1417_s18 = smov %s1076_s19 }
  0x8b   : > { %s1419_s21 = smov %s1088_s22 }
  0x8c   :  { %27 = sbr.rel (!%p25_p9) target bundleno = 14 (0xe), region = 137 }
  0x8e   : > { %s1418_s19 = smov %s1414_s27 }
  0x90   : > { %s1420_s22 = smov %s1416_s1 }
  0x91   :  { %582 = vsyncpa [#allocation3], 1 }
  0x92   :  { %584 = vsyncpa [#allocation3 + $0x1], 1 }
  0x93   :  { %585 = vsyncpa [#allocation6], 1 }
  0x94   :  { %587 = vsyncpa [#allocation6 + $0x1], 1 }
  0x95   :  { %588 = vsyncpa [#allocation4], 1 }
  0x96   :  { %590 = vsyncpa [#allocation4 + $0x1], 1 }
  0x97   :  { %591 = vsyncpa [#allocation10], 1 }
  0x98   :  { %593 = vsyncpa [#allocation10 + $0x1], 1 }

</bundles_post_ra>
